<compile_context>
chip_gen: v7x
topology: tpu7x:2x2x1
jax: 0.10.0
libtpu: 0.0.40
codegen_flags: <defaults>
</compile_context>

<pallas_src>
import jax
import jax.numpy as jnp
from jax.experimental import pallas as pl
from jax.experimental.pallas import tpu as pltpu

_LANE = 128


def _round_up(a, m):
    return ((a + m - 1) // m) * m


def _autoencoder_kernel(x_ref, *refs):
    """Transposed (batch-on-lanes) forward.

    x_ref : (in_dim, TB) bf16 batch tile (batch on the lane axis)
    refs  : (wT_1, b_1, ..., wT_L, b_L, out_ref)
            wT_i : (out_i, in_i) bf16, VMEM-resident across all grid steps
            b_i  : (out_i, 1)    f32, broadcast over the lane (batch) axis
    out   : (out_dim, TB) caller dtype
    ReLU is applied after every layer except the last (the conv5/deconv1 pair
    was fused at prep time, so only the final reconstruction layer is linear).
    Dropout is inference-mode identity.
    """
    out_ref = refs[-1]
    params = refs[:-1]
    n_layers = len(params) // 2  # 9 after conv5/deconv1 fusion

    h = x_ref[...]  # bf16 feeds the MXU directly
    for i in range(n_layers):
        w_t = params[2 * i][...]       # (out_i, in_i) bf16
        b = params[2 * i + 1][...]     # (out_i, 1) f32
        h32 = jnp.dot(w_t, h, preferred_element_type=jnp.float32) + b
        if i < n_layers - 1:
            h32 = jnp.maximum(h32, 0.0)          # f32 ReLU (v5e VPU has no bf16)
            h = h32.astype(jnp.bfloat16)
        else:
            h = h32
    out_ref[...] = h.astype(out_ref.dtype)


def prepare_params(weights, biases):
    """One-time parameter prep (hoisted out of the per-call forward path).

    - Fuses conv5 (no activation) with deconv1 exactly, in f32:
        W' = W5 @ W6,  b' = b5 @ W6 + b6
    - Transposes every weight to (out, in) for the h_T = W^T @ h_T layout.
    - Casts weights to bf16 once; biases stay f32 with shape (out, 1).
    Returns a flat list [wT_1, b_1, ..., wT_9, b_9].
    """
    assert len(weights) == 10 and len(biases) == 10
    w = [jnp.asarray(wi, jnp.float32) for wi in weights]
    b = [jnp.asarray(bi, jnp.float32) for bi in biases]

    w_fused = w[4] @ w[5]              # (hidden//8, hidden//8), folded in f32
    b_fused = b[4] @ w[5] + b[5]
    w_list = w[:4] + [w_fused] + w[6:]
    b_list = b[:4] + [b_fused] + b[6:]

    flat = []
    for wi, bi in zip(w_list, b_list):
        flat.append(jnp.asarray(wi.T, jnp.bfloat16))            # (out, in)
        flat.append(bi.reshape(-1, 1).astype(jnp.float32))      # (out, 1)
    return flat


def c_autoencoder_forward(x, prepared_params, *, batch_tile=4096):
    """x: [B, input_dim] (f32).  prepared_params: output of prepare_params()."""
    B, in_dim = x.shape
    n_layers = len(prepared_params) // 2
    out_dim = prepared_params[-2].shape[0]
    out_dtype = x.dtype

    # --- batch tile selection (lane axis => multiple of 128, or full B) -----
    if B <= _LANE:
        tb = B                                   # single full-array tile
    else:
        # >=2 grid steps when possible (lets v7x use both TensorCores), capped
        # at batch_tile so large batches get big overhead-amortizing tiles.
        tb = min(_round_up(batch_tile, _LANE),
                 max(_LANE, _round_up((B + 1) // 2, _LANE)))

    # --- VMEM budget: shrink tile if needed, raise scoped limit if needed ---
    param_bytes = sum(int(p.size) * p.dtype.itemsize for p in prepared_params)
    max_width = max(prepared_params[2 * i].shape[0] for i in range(n_layers))

    def vmem_needed(t):
        return (2 * in_dim * t * 2                               # bf16 x tiles (double-buffered)
                + 2 * out_dim * t * jnp.dtype(out_dtype).itemsize  # out tiles
                + param_bytes                                    # resident params
                + 4 * max_width * t * 4)                         # f32 working set headroom

    VMEM_SAFE_CAP = 48 * 1024 * 1024  # conservatively below v7x's 64 MiB physical VMEM
    while tb > _LANE and vmem_needed(tb) > VMEM_SAFE_CAP:
        tb = max(_LANE, _round_up(tb // 2, _LANE))

    need = vmem_needed(tb)
    vmem_limit = None
    if need > 12 * 1024 * 1024:  # v5e's default scoped VMEM limit is only 16 MiB
        vmem_limit = int(min(need + (8 << 20), VMEM_SAFE_CAP + (8 << 20)))

    b_pad = _round_up(B, tb)
    grid = (b_pad // tb,)

    # --- wrapper-side layout plumbing: transpose + pad + bf16 in one pass ---
    x_t = jnp.transpose(x)                       # (in_dim, B)
    if b_pad != B:
        x_t = jnp.pad(x_t, ((0, 0), (0, b_pad - B)))
    x_t = x_t.astype(jnp.bfloat16)

    # --- specs ---------------------------------------------------------------
    in_specs = [pl.BlockSpec((in_dim, tb), lambda i: (0, i))]
    for li in range(n_layers):
        w_t = prepared_params[2 * li]
        bb = prepared_params[2 * li + 1]
        in_specs.append(pl.BlockSpec(w_t.shape, lambda i: (0, 0)))   # VMEM-resident
        in_specs.append(pl.BlockSpec(bb.shape, lambda i: (0, 0)))
    out_specs = pl.BlockSpec((out_dim, tb), lambda i: (0, i))

    # Advisory cost estimate for XLA's scheduler.
    flops = int(2 * b_pad * sum(int(prepared_params[2 * i].shape[0])
                                * int(prepared_params[2 * i].shape[1])
                                for i in range(n_layers)))
    bytes_accessed = int(b_pad * in_dim * 2
                         + b_pad * out_dim * jnp.dtype(out_dtype).itemsize
                         + param_bytes)
    cost = pl.CostEstimate(flops=flops, transcendentals=0,
                           bytes_accessed=bytes_accessed)

    out_t = pl.pallas_call(
        _autoencoder_kernel,
        out_shape=jax.ShapeDtypeStruct((out_dim, b_pad), out_dtype),
        grid=grid,
        in_specs=in_specs,
        out_specs=out_specs,
        cost_estimate=cost,
        compiler_params=pltpu.CompilerParams(
            dimension_semantics=("parallel",),   # v7x: shard batch tiles across both TCs
            vmem_limit_bytes=vmem_limit,
        ),
    )(x_t, *prepared_params)

    # Un-transpose (and drop batch padding) back to [B, out_dim].
    return out_t.T[:B]


def init_params(key, config):
    """Deterministic init mimicking nn.Linear (uniform +/- 1/sqrt(fan_in)), stored [in, out]."""
    input_dim = config["input_dim"]
    hidden = config["hidden_dim"]
    latent = config["latent_vector"]

    dims = [
        (input_dim, hidden),          # conv1
        (hidden, hidden // 2),        # conv2
        (hidden // 2, hidden // 4),   # conv3
        (hidden // 4, hidden // 8),   # conv4
        (hidden // 8, latent),        # conv5
        (latent, hidden // 8),        # deconv1
        (hidden // 8, hidden // 4),   # deconv2
        (hidden // 4, hidden // 2),   # deconv3
        (hidden // 2, hidden),        # deconv4
        (hidden, input_dim),          # deconv5
    ]

    weights, biases = [], []
    for (fan_in, fan_out) in dims:
        key, kw, kb = jax.random.split(key, 3)
        bound = 1.0 / jnp.sqrt(jnp.float32(fan_in))
        w = jax.random.uniform(kw, (fan_in, fan_out), jnp.float32, -bound, bound)
        b = jax.random.uniform(kb, (fan_out,), jnp.float32, -bound, bound)
        weights.append(w)
        biases.append(b)
    return weights, biases


def reference_forward(x, weights, biases):
    """Pure-f32 JAX reference faithful to the PyTorch C_AutoEncoder.forward (eval mode):
    ReLU (+ identity dropout) after every Linear except conv5 (latent) and deconv5."""
    h = x.astype(jnp.float32)
    for i, (w, b) in enumerate(zip(weights, biases)):
        h = h @ w + b
        if i not in (4, 9):
            h = jnp.maximum(h, 0.0)
    return h.astype(x.dtype)


if __name__ == "__main__":
    config = {
        "input_dim": 32,
        "hidden_dim": 64,
        "latent_vector": 4,
        "drop_out": 0.1,  # identity at inference (eval mode)
    }

    key = jax.random.PRNGKey(0)
    key, kx = jax.random.split(key)
    batch = 256  # > 128 so the grid has 2 lane-dense tiles (exercises both v7x TCs)
    x = jax.random.normal(kx, (batch, config["input_dim"]), jnp.float32)

    weights, biases = init_params(key, config)
    params = prepare_params(weights, biases)   # one-time: fuse + transpose + bf16 cast

    x_hat = jax.block_until_ready(c_autoencoder_forward(x, params))
    ref = reference_forward(x, weights, biases)

    assert x_hat.shape == (batch, config["input_dim"])
    assert x_hat.dtype == x.dtype
    # bf16 matmuls / f32 accumulation vs pure-f32 reference -> loose tolerance.
    assert jnp.allclose(x_hat, ref, atol=5e-2, rtol=5e-2), "mismatch vs. f32 reference"

    print("KERNEL_OK")
</pallas_src>

<mosaic_0001>
module attributes {stable_mosaic.version = 11 : i64} {
  func.func @_autoencoder_kernel(%arg0: i32, %arg1: memref<32x128xbf16, #tpu.memory_space<vmem>>, %arg2: memref<64x32xbf16, #tpu.memory_space<vmem>>, %arg3: memref<64x1xf32, #tpu.memory_space<vmem>>, %arg4: memref<32x64xbf16, #tpu.memory_space<vmem>>, %arg5: memref<32x1xf32, #tpu.memory_space<vmem>>, %arg6: memref<16x32xbf16, #tpu.memory_space<vmem>>, %arg7: memref<16x1xf32, #tpu.memory_space<vmem>>, %arg8: memref<8x16xbf16, #tpu.memory_space<vmem>>, %arg9: memref<8x1xf32, #tpu.memory_space<vmem>>, %arg10: memref<8x8xbf16, #tpu.memory_space<vmem>>, %arg11: memref<8x1xf32, #tpu.memory_space<vmem>>, %arg12: memref<16x8xbf16, #tpu.memory_space<vmem>>, %arg13: memref<16x1xf32, #tpu.memory_space<vmem>>, %arg14: memref<32x16xbf16, #tpu.memory_space<vmem>>, %arg15: memref<32x1xf32, #tpu.memory_space<vmem>>, %arg16: memref<64x32xbf16, #tpu.memory_space<vmem>>, %arg17: memref<64x1xf32, #tpu.memory_space<vmem>>, %arg18: memref<32x64xbf16, #tpu.memory_space<vmem>>, %arg19: memref<32x1xf32, #tpu.memory_space<vmem>>, %arg20: memref<32x128xf32, #tpu.memory_space<vmem>>) attributes {dimension_semantics = [#tpu.dimension_semantics<parallel>], iteration_bounds = array<i64: 2>, scalar_prefetch = 0 : i64, scratch_operands = 0 : i64, tpu.core_type = #tpu.core_type<tc>, window_params = [{transform_indices = @transform_0, window_bounds = array<i64: 32, 128>}, {pipeline_mode = #tpu.pipeline_mode<synchronous>, transform_indices = @transform_1, window_bounds = array<i64: 64, 32>}, {pipeline_mode = #tpu.pipeline_mode<synchronous>, transform_indices = @transform_2, window_bounds = array<i64: 64, 1>}, {pipeline_mode = #tpu.pipeline_mode<synchronous>, transform_indices = @transform_3, window_bounds = array<i64: 32, 64>}, {pipeline_mode = #tpu.pipeline_mode<synchronous>, transform_indices = @transform_4, window_bounds = array<i64: 32, 1>}, {pipeline_mode = #tpu.pipeline_mode<synchronous>, transform_indices = @transform_5, window_bounds = array<i64: 16, 32>}, {pipeline_mode = #tpu.pipeline_mode<synchronous>, transform_indices = @transform_6, window_bounds = array<i64: 16, 1>}, {pipeline_mode = #tpu.pipeline_mode<synchronous>, transform_indices = @transform_7, window_bounds = array<i64: 8, 16>}, {pipeline_mode = #tpu.pipeline_mode<synchronous>, transform_indices = @transform_8, window_bounds = array<i64: 8, 1>}, {pipeline_mode = #tpu.pipeline_mode<synchronous>, transform_indices = @transform_9, window_bounds = array<i64: 8, 8>}, {pipeline_mode = #tpu.pipeline_mode<synchronous>, transform_indices = @transform_10, window_bounds = array<i64: 8, 1>}, {pipeline_mode = #tpu.pipeline_mode<synchronous>, transform_indices = @transform_11, window_bounds = array<i64: 16, 8>}, {pipeline_mode = #tpu.pipeline_mode<synchronous>, transform_indices = @transform_12, window_bounds = array<i64: 16, 1>}, {pipeline_mode = #tpu.pipeline_mode<synchronous>, transform_indices = @transform_13, window_bounds = array<i64: 32, 16>}, {pipeline_mode = #tpu.pipeline_mode<synchronous>, transform_indices = @transform_14, window_bounds = array<i64: 32, 1>}, {pipeline_mode = #tpu.pipeline_mode<synchronous>, transform_indices = @transform_15, window_bounds = array<i64: 64, 32>}, {pipeline_mode = #tpu.pipeline_mode<synchronous>, transform_indices = @transform_16, window_bounds = array<i64: 64, 1>}, {pipeline_mode = #tpu.pipeline_mode<synchronous>, transform_indices = @transform_17, window_bounds = array<i64: 32, 64>}, {pipeline_mode = #tpu.pipeline_mode<synchronous>, transform_indices = @transform_18, window_bounds = array<i64: 32, 1>}, {transform_indices = @transform_19, window_bounds = array<i64: 32, 128>}]} {
    %c0 = arith.constant 0 : index
    %c0_0 = arith.constant 0 : index
    %0 = vector.load %arg1[%c0, %c0_0] : memref<32x128xbf16, #tpu.memory_space<vmem>>, vector<32x128xbf16>
    %c0_1 = arith.constant 0 : index
    %c0_2 = arith.constant 0 : index
    %1 = vector.load %arg2[%c0_1, %c0_2] : memref<64x32xbf16, #tpu.memory_space<vmem>>, vector<64x32xbf16>
    %c0_3 = arith.constant 0 : index
    %c0_4 = arith.constant 0 : index
    %2 = vector.load %arg3[%c0_3, %c0_4] : memref<64x1xf32, #tpu.memory_space<vmem>>, vector<64x1xf32>
    %cst = arith.constant dense<0.000000e+00> : vector<64x128xf32>
    %3 = tpu.matmul %1, %0, %cst {dimension_numbers = #tpu.dot_dimension_numbers<[1], [0], [0], [1], [0, 0, 1, 1], [], []>} : vector<64x32xbf16>, vector<32x128xbf16>, vector<64x128xf32> -> vector<64x128xf32>
    %4 = vector.broadcast %2 : vector<64x1xf32> to vector<64x128xf32>
    %5 = arith.addf %3, %4 : vector<64x128xf32>
    %cst_5 = arith.constant 0.000000e+00 : f32
    %6 = vector.broadcast %cst_5 : f32 to vector<64x128xf32>
    %7 = arith.maximumf %5, %6 : vector<64x128xf32>
    %8 = arith.truncf %7 : vector<64x128xf32> to vector<64x128xbf16>
    %c0_6 = arith.constant 0 : index
    %c0_7 = arith.constant 0 : index
    %9 = vector.load %arg4[%c0_6, %c0_7] : memref<32x64xbf16, #tpu.memory_space<vmem>>, vector<32x64xbf16>
    %c0_8 = arith.constant 0 : index
    %c0_9 = arith.constant 0 : index
    %10 = vector.load %arg5[%c0_8, %c0_9] : memref<32x1xf32, #tpu.memory_space<vmem>>, vector<32x1xf32>
    %cst_10 = arith.constant dense<0.000000e+00> : vector<32x128xf32>
    %11 = tpu.matmul %9, %8, %cst_10 {dimension_numbers = #tpu.dot_dimension_numbers<[1], [0], [0], [1], [0, 0, 1, 1], [], []>} : vector<32x64xbf16>, vector<64x128xbf16>, vector<32x128xf32> -> vector<32x128xf32>
    %12 = vector.broadcast %10 : vector<32x1xf32> to vector<32x128xf32>
    %13 = arith.addf %11, %12 : vector<32x128xf32>
    %cst_11 = arith.constant 0.000000e+00 : f32
    %14 = vector.broadcast %cst_11 : f32 to vector<32x128xf32>
    %15 = arith.maximumf %13, %14 : vector<32x128xf32>
    %16 = arith.truncf %15 : vector<32x128xf32> to vector<32x128xbf16>
    %c0_12 = arith.constant 0 : index
    %c0_13 = arith.constant 0 : index
    %17 = vector.load %arg6[%c0_12, %c0_13] : memref<16x32xbf16, #tpu.memory_space<vmem>>, vector<16x32xbf16>
    %c0_14 = arith.constant 0 : index
    %c0_15 = arith.constant 0 : index
    %18 = vector.load %arg7[%c0_14, %c0_15] : memref<16x1xf32, #tpu.memory_space<vmem>>, vector<16x1xf32>
    %cst_16 = arith.constant dense<0.000000e+00> : vector<16x128xf32>
    %19 = tpu.matmul %17, %16, %cst_16 {dimension_numbers = #tpu.dot_dimension_numbers<[1], [0], [0], [1], [0, 0, 1, 1], [], []>} : vector<16x32xbf16>, vector<32x128xbf16>, vector<16x128xf32> -> vector<16x128xf32>
    %20 = vector.broadcast %18 : vector<16x1xf32> to vector<16x128xf32>
    %21 = arith.addf %19, %20 : vector<16x128xf32>
    %cst_17 = arith.constant 0.000000e+00 : f32
    %22 = vector.broadcast %cst_17 : f32 to vector<16x128xf32>
    %23 = arith.maximumf %21, %22 : vector<16x128xf32>
    %24 = arith.truncf %23 : vector<16x128xf32> to vector<16x128xbf16>
    %c0_18 = arith.constant 0 : index
    %c0_19 = arith.constant 0 : index
    %25 = vector.load %arg8[%c0_18, %c0_19] : memref<8x16xbf16, #tpu.memory_space<vmem>>, vector<8x16xbf16>
    %c0_20 = arith.constant 0 : index
    %c0_21 = arith.constant 0 : index
    %26 = vector.load %arg9[%c0_20, %c0_21] : memref<8x1xf32, #tpu.memory_space<vmem>>, vector<8x1xf32>
    %cst_22 = arith.constant dense<0.000000e+00> : vector<8x128xf32>
    %27 = tpu.matmul %25, %24, %cst_22 {dimension_numbers = #tpu.dot_dimension_numbers<[1], [0], [0], [1], [0, 0, 1, 1], [], []>} : vector<8x16xbf16>, vector<16x128xbf16>, vector<8x128xf32> -> vector<8x128xf32>
    %28 = vector.broadcast %26 : vector<8x1xf32> to vector<8x128xf32>
    %29 = arith.addf %27, %28 : vector<8x128xf32>
    %cst_23 = arith.constant 0.000000e+00 : f32
    %30 = vector.broadcast %cst_23 : f32 to vector<8x128xf32>
    %31 = arith.maximumf %29, %30 : vector<8x128xf32>
    %32 = arith.truncf %31 : vector<8x128xf32> to vector<8x128xbf16>
    %c0_24 = arith.constant 0 : index
    %c0_25 = arith.constant 0 : index
    %33 = vector.load %arg10[%c0_24, %c0_25] : memref<8x8xbf16, #tpu.memory_space<vmem>>, vector<8x8xbf16>
    %c0_26 = arith.constant 0 : index
    %c0_27 = arith.constant 0 : index
    %34 = vector.load %arg11[%c0_26, %c0_27] : memref<8x1xf32, #tpu.memory_space<vmem>>, vector<8x1xf32>
    %cst_28 = arith.constant dense<0.000000e+00> : vector<8x128xf32>
    %35 = tpu.matmul %33, %32, %cst_28 {dimension_numbers = #tpu.dot_dimension_numbers<[1], [0], [0], [1], [0, 0, 1, 1], [], []>} : vector<8x8xbf16>, vector<8x128xbf16>, vector<8x128xf32> -> vector<8x128xf32>
    %36 = vector.broadcast %34 : vector<8x1xf32> to vector<8x128xf32>
    %37 = arith.addf %35, %36 : vector<8x128xf32>
    %cst_29 = arith.constant 0.000000e+00 : f32
    %38 = vector.broadcast %cst_29 : f32 to vector<8x128xf32>
    %39 = arith.maximumf %37, %38 : vector<8x128xf32>
    %40 = arith.truncf %39 : vector<8x128xf32> to vector<8x128xbf16>
    %c0_30 = arith.constant 0 : index
    %c0_31 = arith.constant 0 : index
    %41 = vector.load %arg12[%c0_30, %c0_31] : memref<16x8xbf16, #tpu.memory_space<vmem>>, vector<16x8xbf16>
    %c0_32 = arith.constant 0 : index
    %c0_33 = arith.constant 0 : index
    %42 = vector.load %arg13[%c0_32, %c0_33] : memref<16x1xf32, #tpu.memory_space<vmem>>, vector<16x1xf32>
    %cst_34 = arith.constant dense<0.000000e+00> : vector<16x128xf32>
    %43 = tpu.matmul %41, %40, %cst_34 {dimension_numbers = #tpu.dot_dimension_numbers<[1], [0], [0], [1], [0, 0, 1, 1], [], []>} : vector<16x8xbf16>, vector<8x128xbf16>, vector<16x128xf32> -> vector<16x128xf32>
    %44 = vector.broadcast %42 : vector<16x1xf32> to vector<16x128xf32>
    %45 = arith.addf %43, %44 : vector<16x128xf32>
    %cst_35 = arith.constant 0.000000e+00 : f32
    %46 = vector.broadcast %cst_35 : f32 to vector<16x128xf32>
    %47 = arith.maximumf %45, %46 : vector<16x128xf32>
    %48 = arith.truncf %47 : vector<16x128xf32> to vector<16x128xbf16>
    %c0_36 = arith.constant 0 : index
    %c0_37 = arith.constant 0 : index
    %49 = vector.load %arg14[%c0_36, %c0_37] : memref<32x16xbf16, #tpu.memory_space<vmem>>, vector<32x16xbf16>
    %c0_38 = arith.constant 0 : index
    %c0_39 = arith.constant 0 : index
    %50 = vector.load %arg15[%c0_38, %c0_39] : memref<32x1xf32, #tpu.memory_space<vmem>>, vector<32x1xf32>
    %cst_40 = arith.constant dense<0.000000e+00> : vector<32x128xf32>
    %51 = tpu.matmul %49, %48, %cst_40 {dimension_numbers = #tpu.dot_dimension_numbers<[1], [0], [0], [1], [0, 0, 1, 1], [], []>} : vector<32x16xbf16>, vector<16x128xbf16>, vector<32x128xf32> -> vector<32x128xf32>
    %52 = vector.broadcast %50 : vector<32x1xf32> to vector<32x128xf32>
    %53 = arith.addf %51, %52 : vector<32x128xf32>
    %cst_41 = arith.constant 0.000000e+00 : f32
    %54 = vector.broadcast %cst_41 : f32 to vector<32x128xf32>
    %55 = arith.maximumf %53, %54 : vector<32x128xf32>
    %56 = arith.truncf %55 : vector<32x128xf32> to vector<32x128xbf16>
    %c0_42 = arith.constant 0 : index
    %c0_43 = arith.constant 0 : index
    %57 = vector.load %arg16[%c0_42, %c0_43] : memref<64x32xbf16, #tpu.memory_space<vmem>>, vector<64x32xbf16>
    %c0_44 = arith.constant 0 : index
    %c0_45 = arith.constant 0 : index
    %58 = vector.load %arg17[%c0_44, %c0_45] : memref<64x1xf32, #tpu.memory_space<vmem>>, vector<64x1xf32>
    %cst_46 = arith.constant dense<0.000000e+00> : vector<64x128xf32>
    %59 = tpu.matmul %57, %56, %cst_46 {dimension_numbers = #tpu.dot_dimension_numbers<[1], [0], [0], [1], [0, 0, 1, 1], [], []>} : vector<64x32xbf16>, vector<32x128xbf16>, vector<64x128xf32> -> vector<64x128xf32>
    %60 = vector.broadcast %58 : vector<64x1xf32> to vector<64x128xf32>
    %61 = arith.addf %59, %60 : vector<64x128xf32>
    %cst_47 = arith.constant 0.000000e+00 : f32
    %62 = vector.broadcast %cst_47 : f32 to vector<64x128xf32>
    %63 = arith.maximumf %61, %62 : vector<64x128xf32>
    %64 = arith.truncf %63 : vector<64x128xf32> to vector<64x128xbf16>
    %c0_48 = arith.constant 0 : index
    %c0_49 = arith.constant 0 : index
    %65 = vector.load %arg18[%c0_48, %c0_49] : memref<32x64xbf16, #tpu.memory_space<vmem>>, vector<32x64xbf16>
    %c0_50 = arith.constant 0 : index
    %c0_51 = arith.constant 0 : index
    %66 = vector.load %arg19[%c0_50, %c0_51] : memref<32x1xf32, #tpu.memory_space<vmem>>, vector<32x1xf32>
    %cst_52 = arith.constant dense<0.000000e+00> : vector<32x128xf32>
    %67 = tpu.matmul %65, %64, %cst_52 {dimension_numbers = #tpu.dot_dimension_numbers<[1], [0], [0], [1], [0, 0, 1, 1], [], []>} : vector<32x64xbf16>, vector<64x128xbf16>, vector<32x128xf32> -> vector<32x128xf32>
    %68 = vector.broadcast %66 : vector<32x1xf32> to vector<32x128xf32>
    %69 = arith.addf %67, %68 : vector<32x128xf32>
    %c0_53 = arith.constant 0 : index
    %c0_54 = arith.constant 0 : index
    %70 = vector.load %arg20[%c0_53, %c0_54] : memref<32x128xf32, #tpu.memory_space<vmem>>, vector<32x128xf32>
    tpu.vector_store %arg20[%c0_53, %c0_54], %69 {strides = array<i32>} : memref<32x128xf32, #tpu.memory_space<vmem>>, vector<32x128xf32>,
    return
  }
  func.func @transform_0(%arg0: i32) -> (i32, i32) {
    %c0_i32 = arith.constant 0 : i32
    %c0_i32_0 = arith.constant 0 : i32
    return %c0_i32, %arg0 : i32, i32
  }
  func.func @transform_1(%arg0: i32) -> (i32, i32) {
    %c0_i32 = arith.constant 0 : i32
    %c0_i32_0 = arith.constant 0 : i32
    %c0_i32_1 = arith.constant 0 : i32
    return %c0_i32, %c0_i32_0 : i32, i32
  }
  func.func @transform_2(%arg0: i32) -> (i32, i32) {
    %c0_i32 = arith.constant 0 : i32
    %c0_i32_0 = arith.constant 0 : i32
    %c0_i32_1 = arith.constant 0 : i32
    return %c0_i32, %c0_i32_0 : i32, i32
  }
  func.func @transform_3(%arg0: i32) -> (i32, i32) {
    %c0_i32 = arith.constant 0 : i32
    %c0_i32_0 = arith.constant 0 : i32
    %c0_i32_1 = arith.constant 0 : i32
    return %c0_i32, %c0_i32_0 : i32, i32
  }
  func.func @transform_4(%arg0: i32) -> (i32, i32) {
    %c0_i32 = arith.constant 0 : i32
    %c0_i32_0 = arith.constant 0 : i32
    %c0_i32_1 = arith.constant 0 : i32
    return %c0_i32, %c0_i32_0 : i32, i32
  }
  func.func @transform_5(%arg0: i32) -> (i32, i32) {
    %c0_i32 = arith.constant 0 : i32
    %c0_i32_0 = arith.constant 0 : i32
    %c0_i32_1 = arith.constant 0 : i32
    return %c0_i32, %c0_i32_0 : i32, i32
  }
  func.func @transform_6(%arg0: i32) -> (i32, i32) {
    %c0_i32 = arith.constant 0 : i32
    %c0_i32_0 = arith.constant 0 : i32
    %c0_i32_1 = arith.constant 0 : i32
    return %c0_i32, %c0_i32_0 : i32, i32
  }
  func.func @transform_7(%arg0: i32) -> (i32, i32) {
    %c0_i32 = arith.constant 0 : i32
    %c0_i32_0 = arith.constant 0 : i32
    %c0_i32_1 = arith.constant 0 : i32
    return %c0_i32, %c0_i32_0 : i32, i32
  }
  func.func @transform_8(%arg0: i32) -> (i32, i32) {
    %c0_i32 = arith.constant 0 : i32
    %c0_i32_0 = arith.constant 0 : i32
    %c0_i32_1 = arith.constant 0 : i32
    return %c0_i32, %c0_i32_0 : i32, i32
  }
  func.func @transform_9(%arg0: i32) -> (i32, i32) {
    %c0_i32 = arith.constant 0 : i32
    %c0_i32_0 = arith.constant 0 : i32
    %c0_i32_1 = arith.constant 0 : i32
    return %c0_i32, %c0_i32_0 : i32, i32
  }
  func.func @transform_10(%arg0: i32) -> (i32, i32) {
    %c0_i32 = arith.constant 0 : i32
    %c0_i32_0 = arith.constant 0 : i32
    %c0_i32_1 = arith.constant 0 : i32
    return %c0_i32, %c0_i32_0 : i32, i32
  }
  func.func @transform_11(%arg0: i32) -> (i32, i32) {
    %c0_i32 = arith.constant 0 : i32
    %c0_i32_0 = arith.constant 0 : i32
    %c0_i32_1 = arith.constant 0 : i32
    return %c0_i32, %c0_i32_0 : i32, i32
  }
  func.func @transform_12(%arg0: i32) -> (i32, i32) {
    %c0_i32 = arith.constant 0 : i32
    %c0_i32_0 = arith.constant 0 : i32
    %c0_i32_1 = arith.constant 0 : i32
    return %c0_i32, %c0_i32_0 : i32, i32
  }
  func.func @transform_13(%arg0: i32) -> (i32, i32) {
    %c0_i32 = arith.constant 0 : i32
    %c0_i32_0 = arith.constant 0 : i32
    %c0_i32_1 = arith.constant 0 : i32
    return %c0_i32, %c0_i32_0 : i32, i32
  }
  func.func @transform_14(%arg0: i32) -> (i32, i32) {
    %c0_i32 = arith.constant 0 : i32
    %c0_i32_0 = arith.constant 0 : i32
    %c0_i32_1 = arith.constant 0 : i32
    return %c0_i32, %c0_i32_0 : i32, i32
  }
  func.func @transform_15(%arg0: i32) -> (i32, i32) {
    %c0_i32 = arith.constant 0 : i32
    %c0_i32_0 = arith.constant 0 : i32
    %c0_i32_1 = arith.constant 0 : i32
    return %c0_i32, %c0_i32_0 : i32, i32
  }
  func.func @transform_16(%arg0: i32) -> (i32, i32) {
    %c0_i32 = arith.constant 0 : i32
    %c0_i32_0 = arith.constant 0 : i32
    %c0_i32_1 = arith.constant 0 : i32
    return %c0_i32, %c0_i32_0 : i32, i32
  }
  func.func @transform_17(%arg0: i32) -> (i32, i32) {
    %c0_i32 = arith.constant 0 : i32
    %c0_i32_0 = arith.constant 0 : i32
    %c0_i32_1 = arith.constant 0 : i32
    return %c0_i32, %c0_i32_0 : i32, i32
  }
  func.func @transform_18(%arg0: i32) -> (i32, i32) {
    %c0_i32 = arith.constant 0 : i32
    %c0_i32_0 = arith.constant 0 : i32
    %c0_i32_1 = arith.constant 0 : i32
    return %c0_i32, %c0_i32_0 : i32, i32
  }
  func.func @transform_19(%arg0: i32) -> (i32, i32) {
    %c0_i32 = arith.constant 0 : i32
    %c0_i32_0 = arith.constant 0 : i32
    return %c0_i32, %arg0 : i32, i32
  }
}

</mosaic_0001>

<bundles_post_ra>
// kernel: tpu_custom_call.1
= control target key start
LH: loop header
LB: loop body
LE: loop exit
PB: predicated region body
PF: predicated region fallthrough
CT: control target
= control target key end

     0   :  { %s2312_s0 = inlined_call_operand.vmem [shape: bf16[32,256], index: 0, kind: input, shape index: {}]   ;;  %s2313_s1 = inlined_call_operand.vmem [shape: bf16[64,32], index: 1, kind: input, shape index: {}]   ;;  %s2314_s2 = inlined_call_operand.vmem [shape: f32[64,1], index: 2, kind: input, shape index: {}]   ;;  %s2315_s3 = inlined_call_operand.vmem [shape: bf16[32,64], index: 3, kind: input, shape index: {}]   ;;  %s2316_s4 = inlined_call_operand.vmem [shape: f32[32,1], index: 4, kind: input, shape index: {}]   ;;  %s2317_s5 = inlined_call_operand.vmem [shape: bf16[16,32], index: 5, kind: input, shape index: {}]   ;;  %s2318_s6 = inlined_call_operand.vmem [shape: f32[16,1], index: 6, kind: input, shape index: {}]   ;;  %s2319_s7 = inlined_call_operand.vmem [shape: bf16[8,16], index: 7, kind: input, shape index: {}]   ;;  %s2320_s8 = inlined_call_operand.vmem [shape: f32[8,1], index: 8, kind: input, shape index: {}]   ;;  %s2321_s9 = inlined_call_operand.vmem [shape: bf16[8,8], index: 9, kind: input, shape index: {}]   ;;  %s2322_s10 = inlined_call_operand.vmem [shape: f32[8,1], index: 10, kind: input, shape index: {}]   ;;  %s2323_s11 = inlined_call_operand.vmem [shape: bf16[16,8], index: 11, kind: input, shape index: {}]   ;;  %s2324_s12 = inlined_call_operand.vmem [shape: f32[16,1], index: 12, kind: input, shape index: {}]   ;;  %s2325_s13 = inlined_call_operand.vmem [shape: bf16[32,16], index: 13, kind: input, shape index: {}]   ;;  %s2326_s14 = inlined_call_operand.vmem [shape: f32[32,1], index: 14, kind: input, shape index: {}]   ;;  %s2327_s15 = inlined_call_operand.vmem [shape: bf16[64,32], index: 15, kind: input, shape index: {}]   ;;  %s2328_s16 = inlined_call_operand.vmem [shape: f32[64,1], index: 16, kind: input, shape index: {}]   ;;  %s2329_s17 = inlined_call_operand.vmem [shape: bf16[32,64], index: 17, kind: input, shape index: {}]   ;;  %s2330_s18 = inlined_call_operand.vmem [shape: f32[32,1], index: 18, kind: input, shape index: {}]   ;;  %s2331_s19 = inlined_call_operand.hbm [shape: f32[32,256], index: 19, kind: output, shape index: {}]  }
   0x1   :  { %2344 = sst [smem:[#allocation12_spill]] %s2312_s0 }
   0x2   :  { %2345 = sst [smem:[#allocation13_spill]] %s2313_s1 }
   0x3   :  { %2346 = sst [smem:[#allocation14_spill]] %s2314_s2 }
   0x4   :  { %2347 = sst [smem:[#allocation15_spill]] %s2315_s3 }
   0x5   :  { %2348 = sst [smem:[#allocation16_spill]] %s2316_s4 }
   0x6   :  { %2349 = sst [smem:[#allocation17_spill]] %s2331_s19 }
   0x7   :  { %24 = vsyncpa [#allocation4], 0 }
   0x8   :  { %26 = vsyncpa [#allocation4 + $0x1], 0  ;;  %s2024_s0 = smov 0   ;;  %s2026_s30 = smov 0  }
   0x9   :  { %s2028_s20 = smov 0   ;;  %s2030_s21 = smov 0  }
   0xa LB: > { %2350 = sst [smem:[#allocation6_spill]] %s1903_s0  ;;  %s2335_s1 = sadd.s32 4294967295, %s1915_s21   ;;  %s1915_s21 = sphi %s2030_s21, %s2370_s21   ;;  %s1911_s20 = sphi %s2028_s20, %s2373_s20   ;;  %s1907_s30 = sphi %s2026_s30, %s2372_s30   ;;  %s1903_s0 = sphi %s2024_s0, %s2371_s0  }
   0xb   : > { %2351 = sst [smem:[#allocation7_spill]] %s1907_s30  ;;  %s1624_s22 = sadd.s32 4294967294, %s1915_s21  }
   0xc   : > { %2352 = sst [smem:[#allocation8_spill]] %s1911_s20  ;;  %s2047_s2 = sadd.s32 1, %s1915_s21  }
   0xd   : > { %2353 = sst [smem:[#allocation9_spill]] %s2047_s2  ;;  %s39_s23 = sadd.s32 1, %s1911_s20 }
   0xe   : > { %s36_s24 = ssub.s32 %s1915_s21, %s2047_s2  ;;  %p46_p0 = scmp.ne.s32.totalorder %s1911_s20, %s1907_s30 }
   0xf   : > { %p37_p1 = scmp.eq.s32.totalorder %s36_s24, 0  ;;  %p47_p2 = scmp.eq.s32.totalorder %s1915_s21, 0 }
  0x10   : > { %p454_p3 = scmp.eq.s32.totalorder %s2335_s1, 1  ;;  %p459_p4 = scmp.ne.s32.totalorder %s1907_s30, %s1903_s0 }
  0x11   : > { %s2060_s25 = scalar_select %p37_p1, %s1911_s20, %s39_s23  }
  0x12   : > { %p48_p5 = por %p47_p2, %p46_p0  ;;  %p2062_p6 = por %p454_p3, %p46_p0 }
  0x13   : > { %2354 = sst [smem:[#allocation10_spill]] %s2060_s25  ;;  %p460_p7 = scmp.eq.s32.totalorder %s1624_s22, 1 }
  0x14   : > { %p1626_p9 = scmp.ge.s32.totalorder %s1915_s21, 2 }
  0x15   : > { %p2066_p8 = por %p460_p7, %p459_p4 }
  0x16   : > { %530 = sbr.rel (%p1626_p9) target bundleno = 41 (0x29), region = 88 }
  0x17   : > { %s2356_s26 = scalar_select %p2066_p8, 1, 0 }
  0x19   : > { %2357 = sst [smem:[#allocation11_spill]] %s2356_s26 }
  0x1d   : > { %533 = sbr.rel (!%p48_p5) target bundleno = 41 (0x29), region = 92  ;;  %s535_s27 = sand.u32 (%p48_p5), 1, %s1911_s20  }
  0x1e   : > { %s1628_s28 = sshll.u32 (%p48_p5), %s1915_s21, 2  ;;  %s1627_s29 = sshll.u32 (%p48_p5), %s535_s27, 4 }
  0x1f   : > { %s2358_s1 = sld [smem:[#allocation12_spill]] (%p48_p5)  ;;  %s537_s22 = scalar_lea.vmem (%p48_p5), [#allocation2], %s1627_s29 }
  0x25   : > { %s539_s25 = scalar_lea.vmem %s2358_s1, %s1628_s28 }
  0x26   : > { %v555_v0 = vld [vmem:[%s539_s25] sm:$0xf]  ;;  %v557_v1 = vld [vmem:[%s539_s25 + $0x8] sm:$0xf]  ;;  %v559_v2 = vld [vmem:[%s539_s25 + $0x10] sm:$0xf] }
  0x27   : > { %556 = vst [vmem:[%s537_s22] sm:$0xf] %v555_v0  ;;  %558 = vst [vmem:[%s537_s22 + $0x4] sm:$0xf] %v557_v1  ;;  %v561_v3 = vld [vmem:[%s539_s25 + $0x18] sm:$0xf] }
  0x28   : > { %560 = vst [vmem:[%s537_s22 + $0x8] sm:$0xf] %v559_v2  ;;  %562 = vst [vmem:[%s537_s22 + $0xc] sm:$0xf] %v561_v3 }
  0x29 PF: > { %p1629_p10 = scmp.ge.s32.totalorder %s1915_s21, 1  ;;  %p592_p11 = scmp.lt.s32.totalorder %s1915_s21, 3 }
  0x2b   : > { %p593_p12 = pnand %p1629_p10, %p592_p11 }
  0x2c   : > { %s2081_s27 = sand.u32 (!%p593_p12), 1, %s1907_s30   ;;  %s2359_s29 = sld [smem:[#allocation13_spill]] (!%p593_p12)  ;;  %vm747_vm0 = vcmask (!%p593_p12), 261120   ;;  %v1917_v7 = vmov (!%p593_p12), 0   ;;  %v939_v23 = vld [vmem:[%s2318_s6] sm:$0xff] (!%p593_p12)  ;;  %v940_v24 = vld [vmem:[%s2318_s6 + $0x8] sm:$0xff] (!%p593_p12) }
  0x2d   : > { %596 = sbr.rel (%p593_p12) target bundleno = 2111 (0x83f), region = 133  ;;  %s1630_s23 = sshll.u32 (!%p593_p12), %s2081_s27, 4  ;;  %1833 = vset.pattern.permute.xlu0 (!%p593_p12), %v1917_v7  ;;  %1834 = vset.pattern.permute.xlu1 (!%p593_p12), %v1917_v7  ;;  %v1004_v25 = vld [vmem:[%s2320_s8] sm:$0xff] (!%p593_p12)  ;;  %v1116_v28 = vld [vmem:[%s2324_s12 + $0x8] sm:$0xff] (!%p593_p12)  ;;  %v1188_v31 = vld [vmem:[%s2326_s14 + $0x10] sm:$0xff] (!%p593_p12)  ;;  %vm875_vm1 = vcmask (!%p593_p12), 523264  }
  0x2e   : > { %s601_s25 = scalar_lea.vmem (!%p593_p12), [#allocation2], %s1630_s23  ;;  %s2360_s20 = sld [smem:[#allocation14_spill]] (!%p593_p12)  ;;  %v1057_v26 = vld [vmem:[%s2322_s10] sm:$0xff] (!%p593_p12)  ;;  %v1187_v30 = vld [vmem:[%s2326_s14 + $0x8] sm:$0xff] (!%p593_p12)  ;;  %v1189_v32 = vld [vmem:[%s2326_s14 + $0x18] sm:$0xff] (!%p593_p12)  ;;  %vm1919_vm2 = vmmov (!%p593_p12), 0  }
  0x2f   : > { %v1835_v5 = vld [vmem:[%s601_s25] sm:$0xff] (!%p593_p12)   ;;  %v1836_v6 = vld [vmem:[%s601_s25 + $0x8] sm:$0xff] (!%p593_p12)   ;;  %s2362_s4 = sld [smem:[#allocation16_spill]] (!%p593_p12)  ;;  %vm1010_vm3 = vcmask (!%p593_p12), 130048   ;;  %vm1067_vm4 = vcmask (!%p593_p12), 1043456   ;;  %vm1063_vm5 = vcmask (!%p593_p12), 64512  }
  0x30   : > { %1708 = vmatprep.subr.bf16.mxu0 (!%p593_p12), %v1835_v5  ;;  %v1115_v27 = vld [vmem:[%s2324_s12] sm:$0xff] (!%p593_p12)  ;;  %v1290_v34 = vld [vmem:[%s2328_s16 + $0x8] sm:$0xff] (!%p593_p12)  ;;  %v1291_v35 = vld [vmem:[%s2328_s16 + $0x10] sm:$0xff] (!%p593_p12)  ;;  %s1631_s28 = sshll.u32 (!%p593_p12), %s2081_s27, 5  ;;  %s2366_s26 = sld [smem:[#allocation17_spill]] (!%p593_p12) }
  0x31   : > { %1709 = vmatpush3.bf16.msra.mxu0 (!%p593_p12), %v1835_v5  ;;  %v1186_v29 = vld [vmem:[%s2326_s14] sm:$0xff] (!%p593_p12)  ;;  %v1292_v36 = vld [vmem:[%s2328_s16 + $0x18] sm:$0xff] (!%p593_p12)  ;;  %v1294_v38 = vld [vmem:[%s2328_s16 + $0x28] sm:$0xff] (!%p593_p12)  ;;  %s653_s23 = scalar_lea.vmem (!%p593_p12), [#allocation3], %s1631_s28 }
  0x32   : > { %v1837_v4 = vld [vmem:[%s2359_s29] sm:$0xff] (!%p593_p12)   ;;  %1710 = vmatprep.subr.bf16.mxu0 (!%p593_p12), %v1836_v6  ;;  %v1838_v11 = vld [vmem:[%s2359_s29 + $0x8] sm:$0xff] (!%p593_p12)   ;;  %v1839_v13 = vld [vmem:[%s2359_s29 + $0x10] sm:$0xff] (!%p593_p12)   ;;  %s1556_s25 = sshll.u32 (!%p593_p12), %s653_s23, 4  ;;  %s2263_s25 = int_to_ptr.vmem [resolvable:$true] %s1556_s25 }
  0x33   : > { %1712 = vmatprep.mubr.msk.bf16.mxu0 (!%p593_p12), %vm747_vm0, %v1837_v4  ;;  %v1840_v17 = vld [vmem:[%s2359_s29 + $0x18] sm:$0xff] (!%p593_p12)   ;;  %v1289_v33 = vld [vmem:[%s2328_s16] sm:$0xff] (!%p593_p12)  ;;  %v1295_v39 = vld [vmem:[%s2328_s16 + $0x30] sm:$0xff] (!%p593_p12)  ;;  %s1853_s28 = scalar_lea.vmem (!%p593_p12), %s2263_s25, 512 }
  0x34   : > { %s2361_s2 = smov %s2360_s20  ;;  %v667_v8 = vld [vmem:[%s2360_s20] sm:$0xff]  ;;  %v1296_v40 = vld [vmem:[%s2328_s16 + $0x38] sm:$0xff]  ;;  %v1451_v42 = vld [vmem:[%s2330_s18 + $0x8] sm:$0xff]  ;;  %s2363_s20 = sld [smem:[#allocation15_spill]] }
  0x35   : > { %v669_v9 = vld [vmem:[%s2361_s2 + $0x10] sm:$0xff]  ;;  %677 = vperm.xlu0 %1833, %v667_v8   ;;  %v668_v10 = vld [vmem:[%s2361_s2 + $0x8] sm:$0xff]  ;;  %v670_v12 = vld [vmem:[%s2361_s2 + $0x18] sm:$0xff]  ;;  %1711 = vmatpush3.bf16.msra.mxu0 %v1836_v6  ;;  %p1854_p13 = scmp.ne.s32.totalorder %s2263_s25, %s1853_s28 }
  0x36   : > { %687 = vperm.xlu1 %1834, %v669_v9   ;;  %v671_v14 = vld [vmem:[%s2361_s2 + $0x20] sm:$0xff]  ;;  %v672_v15 = vld [vmem:[%s2361_s2 + $0x28] sm:$0xff]  ;;  %v673_v16 = vld [vmem:[%s2361_s2 + $0x30] sm:$0xff] }
  0x37   : > { %v674_v18 = vld [vmem:[%s2361_s2 + $0x38] sm:$0xff]  ;;  %v841_v19 = vld [vmem:[%s2362_s4] sm:$0xff]  ;;  %v842_v20 = vld [vmem:[%s2362_s4 + $0x8] sm:$0xff]  ;;  %p1855_p0 = pnand %p1854_p13, %p2062_p6 }
  0x38   : > { %1713 = vmatmul.mubr.msk.bf16.vlgmr.msra.gmra.mrb[0].mxu0 %vm747_vm0, %v1838_v11  ;;  %v843_v21 = vld [vmem:[%s2362_s4 + $0x10] sm:$0xff]  ;;  %v844_v22 = vld [vmem:[%s2362_s4 + $0x18] sm:$0xff]  ;;  %v1293_v37 = vld [vmem:[%s2328_s16 + $0x20] sm:$0xff] }
  0x39   : > { %682 = vperm.xlu0 %1833, %v668_v10   ;;  %1716 = vmatprep.mubr.msk.bf16.mxu0 %vm747_vm0, %v1839_v13  ;;  %v1450_v41 = vld [vmem:[%s2330_s18] sm:$0xff]  ;;  %v1452_v43 = vld [vmem:[%s2330_s18 + $0x10] sm:$0xff]  ;;  %v1453_v44 = vld [vmem:[%s2330_s18 + $0x18] sm:$0xff]  ;;  %p1856_p1 = pneg %p1855_p0 }
  0x3a   : > { %692 = vperm.xlu1 %1834, %v670_v12   ;;  %s2364_s24 = smov %s2363_s20  ;;  %v1841_v45 = vld [vmem:[%s2363_s20] sm:$0xff]   ;;  %s2365_s20 = sadd.s32 4294967295, %s1915_s21  }
  0x3b   : > { %1728 = vmatprep.mubr.msk.bf16.mxu1 %vm875_vm1, %v1841_v45  ;;  %s1669_s30 = sshll.u32 %s2365_s20, 7  ;;  %s1920_s20 = smov [#allocation3]  }
  0x3c   : > { %s2268_s19 = scalar_lea.hbm %s2366_s26, %s1669_s30  ;;  %s1857_s2 = sshll.u32 %s1920_s20, 4  ;;  %s1858_s2 = int_to_ptr.vmem [resolvable:$false] %s1857_s2 }
  0x3d   : > { %697 = vperm.xlu0 %1833, %v671_v14   ;;  %s1859_s4 = scalar_lea.vmem %s1858_s2, 1024  ;;  %p1860_p2 = scmp.lt.s32.totalorder %s2263_s25, %s1858_s2 }
  0x3e   : > { %702 = vperm.xlu1 %1834, %v672_v15   ;;  %p1861_p3 = scmp.lt.s32.totalorder %s1859_s4, %s1853_s28 }
  0x40   : > { %1717 = vmatmul.mubr.msk.bf16.gmra.mrb[4].mxu0 %vm747_vm0, %v1840_v17  ;;  %p1862_p4 = por %p1861_p3, %p1860_p2 }
  0x41   : > { %707 = vperm.xlu0 %1833, %v673_v16  }
  0x42   : > { %712 = vperm.xlu1 %1834, %v674_v18   ;;  %v1842_v18 = vld [vmem:[%s2364_s24 + $0x8] sm:$0xff]   ;;  %p1863_p5 = pnand %p1862_p4, %p1856_p1 }
  0x45   : > { %847 = vperm.xlu0 %1833, %v841_v19   ;;  %v1918_v19 = vmov 0.0  }
  0x46   : > { %852 = vperm.xlu1 %1834, %v842_v20   ;;  %1732 = vmatprep.subr.bf16.mxu0 %v1918_v19 }
  0x47   : > { %1736 = vmatprep.mubr.msk.bf16.mxu0 %vm1919_vm2, %v1918_v19 }
  0x49   : > { %857 = vperm.xlu0 %1833, %v843_v21  }
  0x4a   : > { %862 = vperm.xlu1 %1834, %v844_v22  }
  0x4d   : > { %943 = vperm.xlu0 %1833, %v939_v23  }
  0x4e   : > { %948 = vperm.xlu1 %1834, %v940_v24  }
  0x51   : > { %1007 = vperm.xlu0 %1833, %v1004_v25  }
  0x52   : > { %1060 = vperm.xlu1 %1834, %v1057_v26  }
  0x55   : > { %1119 = vperm.xlu0 %1833, %v1115_v27  }
  0x56   : > { %1124 = vperm.xlu1 %1834, %v1116_v28  }
  0x59   : > { %1192 = vperm.xlu0 %1833, %v1186_v29  }
  0x5a   : > { %1197 = vperm.xlu1 %1834, %v1187_v30  }
  0x5d   : > { %1202 = vperm.xlu0 %1833, %v1188_v31  }
  0x5e   : > { %1207 = vperm.xlu1 %1834, %v1189_v32  }
  0x61   : > { %1299 = vperm.xlu0 %1833, %v1289_v33  }
  0x62   : > { %1304 = vperm.xlu1 %1834, %v1290_v34  }
  0x65   : > { %1309 = vperm.xlu0 %1833, %v1291_v35  }
  0x66   : > { %1314 = vperm.xlu1 %1834, %v1292_v36  }
  0x69   : > { %1319 = vperm.xlu0 %1833, %v1293_v37  }
  0x6a   : > { %1324 = vperm.xlu1 %1834, %v1294_v38   ;;  %v1843_v38 = vld [vmem:[%s2317_s5] sm:$0xff]  }
  0x6d   : > { %1329 = vperm.xlu0 %1833, %v1295_v39  }
  0x6e   : > { %1334 = vperm.xlu1 %1834, %v1296_v40  }
  0x71   : > { %1456 = vperm.xlu0 %1833, %v1450_v41  }
  0x72   : > { %1461 = vperm.xlu1 %1834, %v1451_v42  }
  0x75   : > { %1466 = vperm.xlu0 %1833, %v1452_v43  }
  0x76   : > { %1471 = vperm.xlu1 %1834, %v1453_v44  }
  0xb4   : > { %v678_v46 = vpop.permute.xlu0 %677 }
  0xb5   : > { %v688_v47 = vpop.permute.xlu1 %687 }
  0xb8   : > { %v683_v48 = vpop.permute.xlu0 %682 }
  0xb9   : > { %v693_v49 = vpop.permute.xlu1 %692 }
  0xbc   : > { %v698_v53 = vpop.permute.xlu0 %697 }
  0xbd   : > { %v703_v58 = vpop.permute.xlu1 %702 }
  0xc0   : > { %v708_v1 = vpop.permute.xlu0 %707 }
  0xc1   : > { %v713_v6 = vpop.permute.xlu1 %712 }
  0xc4   : > { %v848_v20 = vpop.permute.xlu0 %847 }
  0xc5   : > { %v853_v21 = vpop.permute.xlu1 %852 }
  0xc8   : > { %v858_v22 = vpop.permute.xlu0 %857 }
  0xc9   : > { %v863_v26 = vpop.permute.xlu1 %862 }
  0xcc   : > { %v944_v39 = vpop.permute.xlu0 %943 }
  0xcd   : > { %v949_v43 = vpop.permute.xlu1 %948 }
 0x10b   : > { %v1714_v50 = vpop.f32.mrb[0].mxu0 }
 0x10c   : > { %v803_v51 = vadd.f32 %v1714_v50, %v688_v47  ;;  %v794_v52 = vpop.f32.mrb[1].mxu0  ;;  %v1003_v50 = vld [vmem:[%s2319_s7] sm:$0xf] }
 0x10d   : > { %v795_v54 = vadd.f32 %v794_v52, %v678_v46  ;;  %v1715_v55 = vpop.f32.mrb[2].mxu0 }
 0x10e   : > { %v806_v56 = vadd.f32 %v1715_v55, %v693_v49  ;;  %v797_v57 = vpop.f32.mrb[3].mxu0  ;;  %v827_v60 = vmax.f32 %v803_v51, 0.0  ;;  %v1008_v51 = vpop.permute.xlu0 %1007 }
 0x10f   : > { %v798_v59 = vadd.f32 %v797_v57, %v683_v48  ;;  %v825_v62 = vmax.f32 %v795_v54, 0.0 }
 0x110   : > { %v828_v61 = vmax.f32 %v806_v56, 0.0 }
 0x111   : > { %v826_v63 = vmax.f32 %v798_v59, 0.0 }
 0x112   : > { %v834_v0 = vpack.c.bf16 %v828_v61, %v827_v60  ;;  %v1056_v60 = vld [vmem:[%s2321_s9] sm:$0xf]  ;;  %v1061_v61 = vpop.permute.xlu1 %1060 }
 0x113   : > { %v1718_v2 = vpop.f32.mrb[4].mxu0  ;;  %v833_v3 = vpack.c.bf16 %v826_v63, %v825_v62 }
 0x114   : > { %v819_v4 = vadd.f32 %v1718_v2, %v708_v1  ;;  %v810_v5 = vpop.f32.mrb[5].mxu0 }
 0x115   : > { %v811_v7 = vadd.f32 %v810_v5, %v698_v53  ;;  %v1719_v8 = vpop.f32.mrb[6].mxu0  ;;  %1720 = vmatprep.subr.bf16.mxu1 %v833_v3 }
 0x116   : > { %v822_v9 = vadd.f32 %v1719_v8, %v713_v6  ;;  %v813_v10 = vpop.f32.mrb[7].mxu0  ;;  %1721 = vmatpush3.bf16.msra.mxu1 %v833_v3  ;;  %v831_v12 = vmax.f32 %v819_v4, 0.0  ;;  %v1844_v6 = vld [vmem:[%s2323_s11] sm:$0xff]   ;;  %v1120_v8 = vpop.permute.xlu0 %1119 }
 0x117   : > { %v814_v11 = vadd.f32 %v813_v10, %v703_v58  ;;  %1722 = vmatprep.subr.bf16.mxu1 %v834_v0  ;;  %v829_v14 = vmax.f32 %v811_v7, 0.0  ;;  %v1845_v7 = vld [vmem:[%s2325_s13] sm:$0xff]  }
 0x118   : > { %v832_v13 = vmax.f32 %v822_v9, 0.0 }
 0x119   : > { %v830_v15 = vmax.f32 %v814_v11, 0.0 }
 0x11a   : > { %v836_v16 = vpack.c.bf16 %v832_v13, %v831_v12  ;;  %1723 = vmatpush3.bf16.msra.mxu1 %v834_v0  ;;  %v1125_v12 = vpop.permute.xlu1 %1124 }
 0x11b   : > { %v835_v17 = vpack.c.bf16 %v830_v15, %v829_v14 }
 0x11d   : > { %1724 = vmatprep.subr.bf16.mxu1 %v835_v17 }
 0x11e   : > { %1725 = vmatpush3.bf16.msra.mxu1 %v835_v17 }
 0x11f   : > { %1726 = vmatprep.subr.bf16.mxu1 %v836_v16 }
 0x122   : > { %1727 = vmatpush3.bf16.msra.mxu1 %v836_v16 }
 0x123   : > { %1740 = vmatprep.subr.bf16.mxu1 %v1918_v19 }
 0x125   : > { %1729 = vmatmul.mubr.msk.bf16.vlgmr.msra.gmra.mrb[0].mxu1 %vm875_vm1, %v1842_v18 }
 0x126   : > { %1742 = vmatprep.mubr.msk.bf16.mxu1 %vm1919_vm2, %v1918_v19 }
 0x1f8   : > { %v1730_v23 = vpop.f32.mrb[0].mxu1 }
 0x1f9   : > { %v925_v24 = vadd.f32 %v1730_v23, %v858_v22  ;;  %v916_v25 = vpop.f32.mrb[1].mxu1  ;;  %v1198_v22 = vpop.permute.xlu1 %1197 }
 0x1fa   : > { %v917_v27 = vadd.f32 %v916_v25, %v848_v20  ;;  %v1731_v28 = vpop.f32.mrb[2].mxu1  ;;  %v1847_v20 = vld [vmem:[%s2327_s15] sm:$0xff]  }
 0x1fb   : > { %v928_v29 = vadd.f32 %v1731_v28, %v863_v26  ;;  %v919_v30 = vpop.f32.mrb[3].mxu1  ;;  %v933_v32 = vmax.f32 %v925_v24, 0.0 }
 0x1fc   : > { %v920_v31 = vadd.f32 %v919_v30, %v853_v21  ;;  %v931_v34 = vmax.f32 %v917_v27, 0.0  ;;  %v1193_v21 = vpop.permute.xlu0 %1192 }
 0x1fd   : > { %v934_v33 = vmax.f32 %v928_v29, 0.0  ;;  %v1208_v27 = vpop.permute.xlu1 %1207 }
 0x1fe   : > { %v932_v35 = vmax.f32 %v920_v31, 0.0 }
 0x1ff   : > { %v936_v36 = vpack.c.bf16 %v934_v33, %v933_v32 }
 0x200   : > { %v935_v37 = vpack.c.bf16 %v932_v35, %v931_v34  ;;  %v1203_v23 = vpop.permute.xlu0 %1202 }
 0x202   : > { %1733 = vmatpush3.bf16.msra.mxu0 %v935_v37 }
 0x203   : > { %1734 = vmatprep.subr.bf16.mxu0 %v1918_v19 }
 0x206   : > { %1735 = vmatpush3.bf16.msra.mxu0 %v936_v36 }
 0x207   : > { %1746 = vmatprep.subr.bf16.mxu0 %v1918_v19 }
 0x209   : > { %1737 = vmatmul.mubr.msk.bf16.vlgmr.msra.gmra.mrb[8].mxu0 %vm747_vm0, %v1843_v38 }
 0x20a   : > { %1748 = vmatprep.mubr.msk.bf16.mxu0 %vm1919_vm2, %v1918_v19 }
 0x2dc   : > { %v993_v40 = vpop.f32.mrb[8].mxu0 }
 0x2dd   : > { %v994_v41 = vadd.f32 %v993_v40, %v944_v39  ;;  %v1738_v42 = vpop.f32.mrb[9].mxu0  ;;  %v1848_v39 = vld [vmem:[%s2327_s15 + $0x8] sm:$0xff]   ;;  %v1849_v40 = vld [vmem:[%s2327_s15 + $0x10] sm:$0xff]  }
 0x2de   : > { %v996_v44 = vpop.f32.mrb[10].mxu0  ;;  %v1851_v42 = vld [vmem:[%s2329_s17] sm:$0xff]  }
 0x2df   : > { %v997_v45 = vadd.f32 %v996_v44, %v949_v43  ;;  %v1739_v46 = vpop.f32.mrb[11].mxu0  ;;  %v1000_v47 = vmax.f32 %v994_v41, 0.0  ;;  %v1850_v41 = vld [vmem:[%s2327_s15 + $0x18] sm:$0xff]   ;;  %v1300_v43 = vpop.permute.xlu0 %1299 }
 0x2e0   : > { %v1305_v44 = vpop.permute.xlu1 %1304 }
 0x2e1   : > { %v1001_v48 = vmax.f32 %v997_v45, 0.0 }
 0x2e3   : > { %v1002_v49 = vpack.c.bf16 %v1001_v48, %v1000_v47  ;;  %v1310_v45 = vpop.permute.xlu0 %1309 }
 0x2e4   : > { %v1315_v46 = vpop.permute.xlu1 %1314 }
 0x2e5   : > { %1741 = vmatpush3.bf16.msra.mxu1 %v1002_v49 }
 0x2e6   : > { %1752 = vmatprep.subr.bf16.mxu1 %v1918_v19 }
 0x2e8   : > { %1743 = vmatmul.mubr.msk.bf16.vlgmr.msra.gmra.mrb[4].mxu1 %vm1010_vm3, %v1003_v50  ;;  %v1320_v50 = vpop.permute.xlu0 %1319 }
 0x2e9   : > { %1754 = vmatprep.mubr.msk.bf16.mxu1 %vm1919_vm2, %v1918_v19  ;;  %v1846_v19 = vld [vmem:[%s2325_s13 + $0x8] sm:$0xff]  }
 0x3bb   : > { %v1048_v52 = vpop.f32.mrb[4].mxu1 }
 0x3bc   : > { %v1049_v53 = vadd.f32 %v1048_v52, %v1008_v51  ;;  %v1744_v54 = vpop.f32.mrb[5].mxu1 }
 0x3bd   : > { %v1051_v55 = vpop.f32.mrb[6].mxu1 }
 0x3be   : > { %v1054_v56 = vmax.f32 %v1049_v53, 0.0  ;;  %v1745_v57 = vpop.f32.mrb[7].mxu1  ;;  %v1325_v55 = vpop.permute.xlu1 %1324 }
 0x3c0   : > { %v1055_v58 = vpack.c.bf16 %v1054_v56, %v1054_v56 }
 0x3c2   : > { %v1069_v59 = vsel %vm1067_vm4, %v1055_v58, 0 }
 0x3c3   : > { %1747 = vmatpush3.bf16.msra.mxu0 %v1069_v59 }
 0x3c6   : > { %1749 = vmatmul.mubr.msk.bf16.vlgmr.msra.gmra.mrb[12].mxu0 %vm1063_vm5, %v1056_v60 }
 0x3c7   : > { %1760 = vmatprep.mubr.msk.bf16.mxu0 %vm1010_vm3, %v1845_v7 }
 0x499   : > { %v1105_v62 = vpop.f32.mrb[12].mxu0 }
 0x49a   : > { %v1106_v63 = vadd.f32 %v1105_v62, %v1061_v61  ;;  %v1750_v0 = vpop.f32.mrb[13].mxu0  ;;  %v1330_v62 = vpop.permute.xlu0 %1329 }
 0x49b   : > { %v1108_v1 = vpop.f32.mrb[14].mxu0 }
 0x49c   : > { %v1111_v2 = vmax.f32 %v1106_v63, 0.0  ;;  %v1751_v3 = vpop.f32.mrb[15].mxu0 }
 0x49d   : > { %v1335_v3 = vpop.permute.xlu1 %1334 }
 0x49e   : > { %v1112_v4 = vpack.c.bf16 %v1111_v2, %v1111_v2 }
 0x4a0   : > { %v1136_v5 = vsel %vm1067_vm4, %v1112_v4, 0 }
 0x4a1   : > { %1753 = vmatpush3.bf16.msra.mxu1 %v1136_v5 }
 0x4a4   : > { %1755 = vmatmul.mubr.msk.bf16.vlgmr.msra.gmra.mrb[8].mxu1 %vm1063_vm5, %v1844_v6 }
 0x4a5   : > { %1768 = vmatprep.mubr.msk.bf16.mxu1 %vm747_vm0, %v1847_v20 }
 0x577   : > { %v1172_v9 = vpop.f32.mrb[8].mxu1 }
 0x578   : > { %v1173_v10 = vadd.f32 %v1172_v9, %v1120_v8  ;;  %v1756_v11 = vpop.f32.mrb[9].mxu1 }
 0x579   : > { %v1175_v13 = vpop.f32.mrb[10].mxu1 }
 0x57a   : > { %v1176_v14 = vadd.f32 %v1175_v13, %v1125_v12  ;;  %v1757_v15 = vpop.f32.mrb[11].mxu1  ;;  %v1179_v16 = vmax.f32 %v1173_v10, 0.0 }
 0x57b   : > { %v1852_v15 = vld [vmem:[%s2329_s17 + $0x8] sm:$0xff]  }
 0x57c   : > { %v1180_v17 = vmax.f32 %v1176_v14, 0.0 }
 0x57e   : > { %v1181_v18 = vpack.c.bf16 %v1180_v17, %v1179_v16  ;;  %v1457_v16 = vpop.permute.xlu0 %1456  ;;  %v1462_v17 = vpop.permute.xlu1 %1461 }
 0x580   : > { %1758 = vmatprep.subr.bf16.mxu0 %v1181_v18 }
 0x581   : > { %1759 = vmatpush3.bf16.msra.mxu0 %v1181_v18 }
 0x582   : > { %v1467_v18 = vpop.permute.xlu0 %1466 }
 0x584   : > { %1761 = vmatmul.mubr.msk.bf16.vlgmr.msra.gmra.mrb[16].mxu0 %vm1010_vm3, %v1846_v19 }
 0x585   : > { %1784 = vmatprep.mubr.msk.bf16.mxu0 %vm875_vm1, %v1851_v42 }
 0x657   : > { %v1762_v24 = vpop.f32.mrb[16].mxu0 }
 0x658   : > { %v1269_v25 = vadd.f32 %v1762_v24, %v1203_v23  ;;  %v1260_v26 = vpop.f32.mrb[17].mxu0 }
 0x659   : > { %v1261_v28 = vadd.f32 %v1260_v26, %v1193_v21  ;;  %v1763_v29 = vpop.f32.mrb[18].mxu0 }
 0x65a   : > { %v1272_v30 = vadd.f32 %v1763_v29, %v1208_v27  ;;  %v1263_v31 = vpop.f32.mrb[19].mxu0  ;;  %v1277_v33 = vmax.f32 %v1269_v25, 0.0 }
 0x65b   : > { %v1264_v32 = vadd.f32 %v1263_v31, %v1198_v22  ;;  %v1275_v35 = vmax.f32 %v1261_v28, 0.0  ;;  %v1472_v22 = vpop.permute.xlu1 %1471 }
 0x65c   : > { %v1278_v34 = vmax.f32 %v1272_v30, 0.0 }
 0x65d   : > { %v1276_v36 = vmax.f32 %v1264_v32, 0.0 }
 0x65e   : > { %v1280_v37 = vpack.c.bf16 %v1278_v34, %v1277_v33 }
 0x65f   : > { %v1279_v38 = vpack.c.bf16 %v1276_v36, %v1275_v35 }
 0x661   : > { %1764 = vmatprep.subr.bf16.mxu1 %v1279_v38 }
 0x662   : > { %1765 = vmatpush3.bf16.msra.mxu1 %v1279_v38 }
 0x663   : > { %1766 = vmatprep.subr.bf16.mxu1 %v1280_v37 }
 0x666   : > { %1767 = vmatpush3.bf16.msra.mxu1 %v1280_v37 }
 0x669   : > { %1769 = vmatmul.mubr.msk.bf16.vlgmr.msra.gmra.mrb[12].mxu1 %vm747_vm0, %v1848_v39 }
 0x66a   : > { %1772 = vmatprep.mubr.msk.bf16.mxu1 %vm747_vm0, %v1849_v40 }
 0x671   : > { %1773 = vmatmul.mubr.msk.bf16.gmra.mrb[16].mxu1 %vm747_vm0, %v1850_v41 }
 0x73c   : > { %v1770_v47 = vpop.f32.mrb[12].mxu1 }
 0x73d   : > { %v1412_v48 = vadd.f32 %v1770_v47, %v1310_v45  ;;  %v1403_v49 = vpop.f32.mrb[13].mxu1 }
 0x73e   : > { %v1404_v51 = vadd.f32 %v1403_v49, %v1300_v43  ;;  %v1771_v52 = vpop.f32.mrb[14].mxu1 }
 0x73f   : > { %v1415_v53 = vadd.f32 %v1771_v52, %v1315_v46  ;;  %v1406_v54 = vpop.f32.mrb[15].mxu1  ;;  %v1436_v57 = vmax.f32 %v1412_v48, 0.0 }
 0x740   : > { %v1407_v56 = vadd.f32 %v1406_v54, %v1305_v44  ;;  %v1434_v59 = vmax.f32 %v1404_v51, 0.0 }
 0x741   : > { %v1437_v58 = vmax.f32 %v1415_v53, 0.0 }
 0x742   : > { %v1435_v60 = vmax.f32 %v1407_v56, 0.0 }
 0x743   : > { %v1443_v61 = vpack.c.bf16 %v1437_v58, %v1436_v57 }
 0x744   : > { %v1442_v63 = vpack.c.bf16 %v1435_v60, %v1434_v59  ;;  %v1774_v0 = vpop.f32.mrb[16].mxu1 }
 0x745   : > { %v1428_v1 = vadd.f32 %v1774_v0, %v1330_v62  ;;  %v1419_v2 = vpop.f32.mrb[17].mxu1 }
 0x746   : > { %v1420_v4 = vadd.f32 %v1419_v2, %v1320_v50  ;;  %v1775_v5 = vpop.f32.mrb[18].mxu1  ;;  %1776 = vmatprep.subr.bf16.mxu0 %v1442_v63 }
 0x747   : > { %v1431_v6 = vadd.f32 %v1775_v5, %v1335_v3  ;;  %v1422_v7 = vpop.f32.mrb[19].mxu1  ;;  %1777 = vmatpush3.bf16.msra.mxu0 %v1442_v63  ;;  %v1440_v9 = vmax.f32 %v1428_v1, 0.0 }
 0x748   : > { %v1423_v8 = vadd.f32 %v1422_v7, %v1325_v55  ;;  %1778 = vmatprep.subr.bf16.mxu0 %v1443_v61  ;;  %v1438_v11 = vmax.f32 %v1420_v4, 0.0 }
 0x749   : > { %v1441_v10 = vmax.f32 %v1431_v6, 0.0 }
 0x74a   : > { %v1439_v12 = vmax.f32 %v1423_v8, 0.0 }
 0x74b   : > { %v1445_v13 = vpack.c.bf16 %v1441_v10, %v1440_v9  ;;  %1779 = vmatpush3.bf16.msra.mxu0 %v1443_v61 }
 0x74c   : > { %v1444_v14 = vpack.c.bf16 %v1439_v12, %v1438_v11 }
 0x74e   : > { %1780 = vmatprep.subr.bf16.mxu0 %v1444_v14 }
 0x74f   : > { %1781 = vmatpush3.bf16.msra.mxu0 %v1444_v14 }
 0x750   : > { %1782 = vmatprep.subr.bf16.mxu0 %v1445_v13 }
 0x753   : > { %1783 = vmatpush3.bf16.msra.mxu0 %v1445_v13 }
 0x756   : > { %1785 = vmatmul.mubr.msk.bf16.vlgmr.msra.gmra.mrb[20].mxu0 %vm875_vm1, %v1852_v15 }
 0x829   : > { %v1786_v19 = vpop.f32.mrb[20].mxu0 }
 0x82a   : > { %v1533_v20 = vadd.f32 %v1786_v19, %v1467_v18  ;;  %v1524_v21 = vpop.f32.mrb[21].mxu0 }
 0x82b   : > { %v1525_v23 = vadd.f32 %v1524_v21, %v1457_v16  ;;  %v1787_v24 = vpop.f32.mrb[22].mxu0 }
 0x82c   : > { %1541 = vst [vmem:[%s653_s23 + $0x10] sm:$0xff] %v1533_v20  ;;  %v1536_v25 = vadd.f32 %v1787_v24, %v1472_v22  ;;  %v1527_v26 = vpop.f32.mrb[23].mxu0 }
 0x82d   : > { %1539 = vst [vmem:[%s653_s23] sm:$0xff] %v1525_v23  ;;  %v1528_v27 = vadd.f32 %v1527_v26, %v1462_v17 }
 0x82e   : > { %1542 = vst [vmem:[%s653_s23 + $0x18] sm:$0xff] %v1536_v25 }
 0x82f   : > { %1540 = vst [vmem:[%s653_s23 + $0x8] sm:$0xff] %v1528_v27 }
 0x830   : > { %1866 = shalt.err (!%p1863_p5)
}
 0x831   : > { %s1867_s23 = scalar_lea.hbm %s2268_s19, 512  ;;  %s1871_s1 = scalar_lea.hbm %s2366_s26, 1024 }
 0x832   : > { %p1868_p7 = scmp.ne.s32.totalorder %s2268_s19, %s1867_s23  ;;  %p1872_p12 = scmp.lt.u32.totalorder %s2268_s19, %s2366_s26 }
 0x833   : > { %p1873_p13 = scmp.lt.u32.totalorder %s1871_s1, %s1867_s23  ;;  %p1875_p1 = scmp.lt.u32.totalorder %s1867_s23, %s2268_s19 }
 0x834   : > { %p1869_p10 = pnand %p1868_p7, %p2062_p6 }
 0x835   : > { %p1874_p0 = por %p1873_p13, %p1872_p12 }
 0x836   : > { %p1870_p11 = pneg %p1869_p10 }
 0x837   : > { %p1876_p2 = por %p1875_p1, %p1874_p0 }
 0x839   : > { %p1877_p3 = pnand %p1876_p2, %p1870_p11 }
 0x83b   : > { %1880 = shalt.err (!%p1877_p3)
}
 0x83c   : > { %s1921_s4 = smov 128   ;;  %s1922_s28 = smov 256  }
 0x83d   : > { %s1923_s0 = smov 8   ;;  %s2367_s30 = scalar_lea.sflag [#allocation4], %s2081_s27 }
 0x83e   : > { %1788 = dma.vmem_to_hbm [thread:$0]  (%p2062_p6), %s2263_s25, 512, %s2268_s19, %s2367_s30, %s1921_s4, %s1922_s28, %s1923_s0  }
 0x83f PF: > { %s2368_s22 = sld [smem:[#allocation6_spill]]  ;;  %p1791_p4 = pnand %p1626_p9, %p2066_p8 }
 0x845   : > { %s1571_s1 = sand.u32 1, %s2368_s22  }
 0x846   : > { %s1572_s23 = scalar_lea.sflag [#allocation4], %s1571_s1 }
 0x847   : > { %1898 = dma.done.wait (!%p1791_p4), %s1572_s23, 512  }
 0x848   : > { %1900 = vsyncadd (!%p1791_p4), %s1572_s23, 4294966784  ;;  %s2370_s21 = sld [smem:[#allocation9_spill]]  ;;  %s2371_s0 = sld [smem:[#allocation7_spill]] }
 0x849   : > { %s2372_s30 = sld [smem:[#allocation8_spill]]  ;;  %s2373_s20 = sld [smem:[#allocation10_spill]] }
 0x84e   : > { %p29_p5 = scmp.ge.s32.totalorder %s2370_s21, 4  }
 0x850   :  { %31 = sbr.rel (!%p29_p5) target bundleno = 10 (0xa), region = 177 }
 0x857   :  { %1577 = vsyncpa [#allocation4], 1 }
 0x858   :  { %1579 = vsyncpa [#allocation4 + $0x1], 1 }

</bundles_post_ra>
